<compile_context>
chip_gen: v6e
topology: v6e:2x2x1
jax: 0.10.0
libtpu: 0.0.40
codegen_flags: <defaults>
</compile_context>

<pallas_src>
import functools

import jax
import jax.numpy as jnp
from jax.experimental import pallas as pl
from jax.experimental.pallas import tpu as pltpu


def _channel_attention_kernel(
    x_ref, w1_ref, b1_ref, w2_ref, b2_ref,    # inputs
    o_ref,                                    # output block [1, TB, C]
    sum_acc, max_acc,                         # VMEM scratch [TR, ACC_W]
    *, tb, c, hw, acc_w, groups, rem, vreg_partials,
):
    s = pl.program_id(1)
    last = pl.num_programs(1) - 1
    tr = tb * c

    @pl.when(s == 0)
    def _init():
        sum_acc[...] = jnp.zeros_like(sum_acc)
        max_acc[...] = jnp.full(max_acc.shape, -jnp.inf, max_acc.dtype)

    def chunk(g):
        # Lane-aligned [TR, ACC_W] slice of the streamed tile (static offsets).
        return x_ref[:, g * acc_w:(g + 1) * acc_w]

    def accumulate(n_full, masked):
        """Fused single-load fold of the current tile into sum/max accumulators.

        n_full : number of fully valid ACC_W-wide chunks in this tile.
        masked : None, or (group_index, n_valid_lanes) for the single partially
                 valid chunk (only ever exists on the last step of a ragged HW).
        Chunks beyond the valid region are skipped entirely at trace time.
        """
        def masked_vals():
            g, nvalid = masked
            # One hoisted iota; the threshold is a trace-time constant.
            lane = jax.lax.broadcasted_iota(jnp.int32, (tr, acc_w), 1)
            keep = lane < nvalid
            v = chunk(g)
            return jnp.where(keep, v, 0.0), jnp.where(keep, v, -jnp.inf)

        if vreg_partials:
            # Per-step partials live in vregs; one accumulator RMW per step.
            ps, pm = None, None
            for g in range(n_full):
                v = chunk(g)
                ps = v if ps is None else ps + v
                pm = v if pm is None else jnp.maximum(pm, v)
            if masked is not None:
                vs, vm = masked_vals()
                ps = vs if ps is None else ps + vs
                pm = vm if pm is None else jnp.maximum(pm, vm)
            if ps is not None:
                sum_acc[...] = sum_acc[...] + ps
                max_acc[...] = jnp.maximum(max_acc[...], pm)
        else:
            # Large row tiles: fold straight into the VMEM accumulators so vreg
            # pressure stays bounded regardless of TR.
            for g in range(n_full):
                v = chunk(g)
                sum_acc[...] = sum_acc[...] + v
                max_acc[...] = jnp.maximum(max_acc[...], v)
            if masked is not None:
                vs, vm = masked_vals()
                sum_acc[...] = sum_acc[...] + vs
                max_acc[...] = jnp.maximum(max_acc[...], vm)

    if rem == 0:
        # No padding anywhere: every step takes the unmasked fast path.
        accumulate(groups, None)
    else:
        @pl.when(s < last)
        def _bulk():
            accumulate(groups, None)

        n_full_last = rem // acc_w
        tail = rem % acc_w
        masked_last = (n_full_last, tail) if tail else None

        @pl.when(s == last)
        def _tail():
            accumulate(n_full_last, masked_last)

    # Finalize: one cross-lane reduce + tiny fused MLP + sigmoid per row tile.
    @pl.when(s == last)
    def _finalize():
        avg = jnp.sum(sum_acc[...].reshape(tb, c, acc_w), axis=-1) / hw   # [TB, C]
        mx = jnp.max(max_acc[...].reshape(tb, c, acc_w), axis=-1)         # [TB, C]
        pooled = jnp.concatenate([avg, mx], axis=0)                       # [2*TB, C]
        h = jnp.dot(pooled, w1_ref[...], preferred_element_type=jnp.float32) + b1_ref[...]
        h = jnp.maximum(h, 0.0)                                           # ReLU
        y = jnp.dot(h, w2_ref[...], preferred_element_type=jnp.float32) + b2_ref[...]
        gate = jax.nn.sigmoid(y[0:tb, :] + y[tb:2 * tb, :])               # [TB, C]
        o_ref[0, :, :] = gate.astype(o_ref.dtype)


def _vmem_capacity_bytes():
    """Physical per-core VMEM; conservative fallback = 64 MiB (v7x)."""
    try:
        info = pltpu.get_tpu_info()
        cap = int(getattr(info, "vmem_capacity_bytes", 0) or 0)
        if cap > 0:
            return cap
    except Exception:
        pass
    return 64 << 20


def _pick_tiles(B, C, HW, ts_override=None):
    itemsize = 4
    vmem_cap = _vmem_capacity_bytes()
    # Whole-kernel VMEM target: ~3/4 of physical, never above 96 MiB
    # (v5e/v6e: 96 of 128 MiB physical; v7x: 48 of 64 MiB).
    kernel_budget = min((vmem_cap * 3) // 4, 96 << 20)
    # Per-input-buffer byte target (tiles are double-buffered).  ~8 MiB keeps
    # the ~0.35 us per-step overhead at a few percent of step time while
    # bounding the size of the unrolled fold loop.
    buf_budget = min(kernel_budget // 4, 8 << 20)

    # Row tiles: tb whole batch elements (tr = tb*C rows) so the finalize MLP
    # always sees complete samples.  Legal row blocks: tr % 8 == 0 or full dim.
    cands = [d for d in range(1, B + 1)
             if B % d == 0 and ((d * C) % 8 == 0 or d == B)]
    # Keep >= 2 tiles on the parallel (row) axis when possible (v7x megacore).
    if any(d < B for d in cands):
        cands = [d for d in cands if d < B]

    def ts_for(tr):
        if ts_override is not None:
            return ts_override
        max_ts = buf_budget // (tr * itemsize)
        if HW <= max_ts:
            return HW                               # full-dim block: always legal
        return max(128, (max_ts // 128) * 128)      # lane-aligned spatial tile

    def cost(d):
        tr = d * C
        steps = (B // d) * pl.cdiv(HW, ts_for(tr))
        # Prefer fewer grid steps, then row tiles small enough for the
        # in-register fused fold, then smaller accumulators.
        return (steps, 0 if tr <= 128 else 1, tr)

    tb = min(cands, key=cost)
    tr = tb * C
    ts = ts_for(tr)
    return tb, tr, ts, kernel_budget


def channel_attention(x_nchw, w1, b1, w2, b2, *, ts_override=None):
    """CBAM channel gate.  x_nchw: [B, C, H, W] f32 -> gate [B, C, 1, 1] f32.

    Computes sigmoid(fc(avg_pool(x)) + fc(max_pool(x))) per sample; identical
    per-sample math to the PyTorch module (whose `.squeeze()` only changes the
    output rank when B == 1).
    """
    B, C, H, W = x_nchw.shape
    hidden = w1.shape[0]
    HW = H * W

    if ts_override is not None:
        assert ts_override == HW or (ts_override % 128 == 0 and ts_override <= HW)

    x2 = x_nchw.reshape(B * C, HW)                  # free view of NCHW
    w1t = jnp.asarray(w1).T.reshape(C, hidden)      # row-major matmul weights
    w2t = jnp.asarray(w2).T.reshape(hidden, C)
    b1r = jnp.asarray(b1).reshape(1, hidden)
    b2r = jnp.asarray(b2).reshape(1, C)

    tb, tr, ts, kernel_budget = _pick_tiles(B, C, HW, ts_override)
    n_rows = B // tb
    n_spatial = pl.cdiv(HW, ts)
    rem = HW % ts
    acc_w = 128 if ts % 128 == 0 else ts
    groups = ts // acc_w
    # -inf max init is safe: ragged tiling implies >= 2 spatial tiles, so every
    # accumulator lane sees at least one valid element from the full tiles.
    assert rem == 0 or n_spatial >= 2
    # Small row tiles fold with vreg-resident partials; large ones fold
    # directly into VMEM scratch (bounded vreg pressure for any TR).
    vreg_partials = tr * acc_w * 4 <= 64 * 1024

    kernel = functools.partial(
        _channel_attention_kernel,
        tb=tb, c=C, hw=HW, acc_w=acc_w, groups=groups, rem=rem,
        vreg_partials=vreg_partials,
    )

    in_specs = [
        pl.BlockSpec((tr, ts), lambda r, s: (r, s)),       # streamed x tiles
        pl.BlockSpec((C, hidden), lambda r, s: (0, 0)),    # w1^T (resident)
        pl.BlockSpec((1, hidden), lambda r, s: (0, 0)),    # b1
        pl.BlockSpec((hidden, C), lambda r, s: (0, 0)),    # w2^T
        pl.BlockSpec((1, C), lambda r, s: (0, 0)),         # b2
    ]
    out_spec = pl.BlockSpec((1, tb, C), lambda r, s: (r, 0, 0))  # revisited over s

    weights_bytes = 4 * (w1t.size + w2t.size + b1r.size + b2r.size)
    needed = (2 * tr * ts * 4            # double-buffered input tile
              + 2 * weights_bytes        # tiny resident weights (double-buffered)
              + 2 * tr * acc_w * 4       # sum/max scratch
              + 2 * tb * C * 4)          # output block
    vmem_limit = int(min(max(needed * 3 // 2 + (2 << 20), 20 << 20), kernel_budget))

    cost = pl.CostEstimate(
        flops=2 * B * C * HW + 8 * B * C * hidden,
        transcendentals=B * C,
        bytes_accessed=4 * (B * C * HW + 2 * B * C
                            + w1t.size + w2t.size + b1r.size + b2r.size),
    )

    out3 = pl.pallas_call(
        kernel,
        out_shape=jax.ShapeDtypeStruct((n_rows, tb, C), jnp.float32),
        grid_spec=pltpu.PrefetchScalarGridSpec(
            num_scalar_prefetch=0,
            grid=(n_rows, n_spatial),
            in_specs=in_specs,
            out_specs=out_spec,
            scratch_shapes=[
                pltpu.VMEM((tr, acc_w), jnp.float32),   # running sum
                pltpu.VMEM((tr, acc_w), jnp.float32),   # running max
            ],
        ),
        compiler_params=pltpu.CompilerParams(
            dimension_semantics=("parallel", "arbitrary"),
            vmem_limit_bytes=vmem_limit,
        ),
        cost_estimate=cost,
    )(x2, w1t, b1r, w2t, b2r)

    return out3.reshape(B, C, 1, 1)


def init_params(key, in_channels, reduction_ratio=4):
    """Deterministic init mimicking torch.nn.Linear default U[-1/sqrt(fan_in), 1/sqrt(fan_in)]."""
    hidden = in_channels // reduction_ratio
    k1, k2, k3, k4 = jax.random.split(key, 4)
    bound1 = 1.0 / jnp.sqrt(in_channels)
    bound2 = 1.0 / jnp.sqrt(hidden)
    w1 = jax.random.uniform(k1, (hidden, in_channels), jnp.float32, -bound1, bound1)
    b1 = jax.random.uniform(k2, (hidden,), jnp.float32, -bound1, bound1)
    w2 = jax.random.uniform(k3, (in_channels, hidden), jnp.float32, -bound2, bound2)
    b2 = jax.random.uniform(k4, (in_channels,), jnp.float32, -bound2, bound2)
    return w1, b1, w2, b2


def reference(x_nchw, w1, b1, w2, b2):
    avg = jnp.mean(x_nchw, axis=(2, 3))
    mx = jnp.max(x_nchw, axis=(2, 3))

    def fc(v):
        h = jnp.maximum(v @ w1.T + b1, 0.0)
        return h @ w2.T + b2

    return jax.nn.sigmoid(fc(avg) + fc(mx))[:, :, None, None]


if __name__ == "__main__":
    key = jax.random.PRNGKey(0)

    configs = [
        # (B, C, H, W, reduction_ratio, ts_override)
        (2, 16, 16, 16, 4, None),    # primary small shape: single spatial tile
        (2, 8, 50, 50, 4, None),     # HW=2500 fits one tile (unmasked fast path)
        (2, 8, 50, 50, 4, 1024),     # forced spatial tiling: ragged masked tail
        (4, 128, 16, 16, 4, None),   # 512 rows: >=2 row tiles on parallel axis
        (2, 256, 20, 20, 4, 256),    # large row tile (VMEM-resident fold) + ragged
    ]
    for idx, (B, C, H, W, rr, ts_o) in enumerate(configs):
        kx, kp, key = jax.random.split(key, 3)
        x = jax.random.normal(kx, (B, C, H, W), jnp.float32)
        w1, b1, w2, b2 = init_params(kp, C, reduction_ratio=rr)

        out = jax.block_until_ready(
            channel_attention(x, w1, b1, w2, b2, ts_override=ts_o))
        ref = reference(x, w1, b1, w2, b2)
        assert out.shape == (B, C, 1, 1)
        assert jnp.allclose(out, ref, atol=1e-5, rtol=1e-5), f"mismatch in config {idx}"

    print("KERNEL_OK")
</pallas_src>

<mosaic_0001>
module attributes {stable_mosaic.version = 11 : i64} {
  func.func @_channel_attention_kernel(%arg0: i32, %arg1: i32, %arg2: memref<16x256xf32, #tpu.memory_space<vmem>>, %arg3: memref<16x4xf32, #tpu.memory_space<vmem>>, %arg4: memref<1x4xf32, #tpu.memory_space<vmem>>, %arg5: memref<4x16xf32, #tpu.memory_space<vmem>>, %arg6: memref<1x16xf32, #tpu.memory_space<vmem>>, %arg7: memref<1x1x16xf32, #tpu.memory_space<vmem>>, %arg8: memref<16x128xf32, #tpu.memory_space<vmem>>, %arg9: memref<16x128xf32, #tpu.memory_space<vmem>>) attributes {dimension_semantics = [#tpu.dimension_semantics<parallel>, #tpu.dimension_semantics<arbitrary>], iteration_bounds = array<i64: 2, 1>, scalar_prefetch = 0 : i64, scratch_operands = 2 : i64, tpu.core_type = #tpu.core_type<tc>, window_params = [{transform_indices = @transform_0, window_bounds = array<i64: 16, 256>}, {pipeline_mode = #tpu.pipeline_mode<synchronous>, transform_indices = @transform_1, window_bounds = array<i64: 16, 4>}, {pipeline_mode = #tpu.pipeline_mode<synchronous>, transform_indices = @transform_2, window_bounds = array<i64: 1, 4>}, {pipeline_mode = #tpu.pipeline_mode<synchronous>, transform_indices = @transform_3, window_bounds = array<i64: 4, 16>}, {pipeline_mode = #tpu.pipeline_mode<synchronous>, transform_indices = @transform_4, window_bounds = array<i64: 1, 16>}, {transform_indices = @transform_5, window_bounds = array<i64: 1, 1, 16>}]} {
    %c0_i32 = arith.constant 0 : i32
    %0 = arith.cmpi eq, %arg1, %c0_i32 : i32
    %1 = arith.extui %0 : i1 to i32
    %c0_i32_0 = arith.constant 0 : i32
    %2 = arith.cmpi ne, %1, %c0_i32_0 : i32
    scf.if %2 {
      %cst = arith.constant 0.000000e+00 : f32
      %16 = vector.broadcast %cst : f32 to vector<16x128xf32>
      %c0_13 = arith.constant 0 : index
      %c0_14 = arith.constant 0 : index
      %17 = vector.load %arg8[%c0_13, %c0_14] : memref<16x128xf32, #tpu.memory_space<vmem>>, vector<16x128xf32>
      tpu.vector_store %arg8[%c0_13, %c0_14], %16 {strides = array<i32>} : memref<16x128xf32, #tpu.memory_space<vmem>>, vector<16x128xf32>,
      %cst_15 = arith.constant 0xFF800000 : f32
      %18 = vector.broadcast %cst_15 : f32 to vector<16x128xf32>
      %c0_16 = arith.constant 0 : index
      %c0_17 = arith.constant 0 : index
      %19 = vector.load %arg9[%c0_16, %c0_17] : memref<16x128xf32, #tpu.memory_space<vmem>>, vector<16x128xf32>
      tpu.vector_store %arg9[%c0_16, %c0_17], %18 {strides = array<i32>} : memref<16x128xf32, #tpu.memory_space<vmem>>, vector<16x128xf32>,
    } else {
    }
    %c0 = arith.constant 0 : index
    %c0_1 = arith.constant 0 : index
    %3 = vector.load %arg2[%c0, %c0_1] : memref<16x256xf32, #tpu.memory_space<vmem>>, vector<16x128xf32>
    %c0_2 = arith.constant 0 : index
    %c128 = arith.constant 128 : index
    %4 = vector.load %arg2[%c0_2, %c128] : memref<16x256xf32, #tpu.memory_space<vmem>>, vector<16x128xf32>
    %5 = arith.addf %3, %4 : vector<16x128xf32>
    %6 = arith.maximumf %3, %4 : vector<16x128xf32>
    %c0_3 = arith.constant 0 : index
    %c0_4 = arith.constant 0 : index
    %7 = vector.load %arg8[%c0_3, %c0_4] : memref<16x128xf32, #tpu.memory_space<vmem>>, vector<16x128xf32>
    %8 = arith.addf %7, %5 : vector<16x128xf32>
    %c0_5 = arith.constant 0 : index
    %c0_6 = arith.constant 0 : index
    %9 = vector.load %arg8[%c0_5, %c0_6] : memref<16x128xf32, #tpu.memory_space<vmem>>, vector<16x128xf32>
    tpu.vector_store %arg8[%c0_5, %c0_6], %8 {strides = array<i32>} : memref<16x128xf32, #tpu.memory_space<vmem>>, vector<16x128xf32>,
    %c0_7 = arith.constant 0 : index
    %c0_8 = arith.constant 0 : index
    %10 = vector.load %arg9[%c0_7, %c0_8] : memref<16x128xf32, #tpu.memory_space<vmem>>, vector<16x128xf32>
    %11 = arith.maximumf %10, %6 : vector<16x128xf32>
    %c0_9 = arith.constant 0 : index
    %c0_10 = arith.constant 0 : index
    %12 = vector.load %arg9[%c0_9, %c0_10] : memref<16x128xf32, #tpu.memory_space<vmem>>, vector<16x128xf32>
    tpu.vector_store %arg9[%c0_9, %c0_10], %11 {strides = array<i32>} : memref<16x128xf32, #tpu.memory_space<vmem>>, vector<16x128xf32>,
    %c0_i32_11 = arith.constant 0 : i32
    %13 = arith.cmpi eq, %arg1, %c0_i32_11 : i32
    %14 = arith.extui %13 : i1 to i32
    %c0_i32_12 = arith.constant 0 : i32
    %15 = arith.cmpi ne, %14, %c0_i32_12 : i32
    scf.if %15 {
      %c0_13 = arith.constant 0 : index
      %c0_14 = arith.constant 0 : index
      %16 = vector.load %arg8[%c0_13, %c0_14] : memref<16x128xf32, #tpu.memory_space<vmem>>, vector<16x128xf32>
      %17 = vector.shape_cast %16 : vector<16x128xf32> to vector<1x16x128xf32>
      %cst = arith.constant dense<0.000000e+00> : vector<1x16xf32>
      %18 = vector.multi_reduction <add>, %17, %cst [2] : vector<1x16x128xf32> to vector<1x16xf32>
      %cst_15 = arith.constant 2.560000e+02 : f32
      %19 = vector.broadcast %cst_15 : f32 to vector<1x16xf32>
      %20 = arith.divf %18, %19 : vector<1x16xf32>
      %c0_16 = arith.constant 0 : index
      %c0_17 = arith.constant 0 : index
      %21 = vector.load %arg9[%c0_16, %c0_17] : memref<16x128xf32, #tpu.memory_space<vmem>>, vector<16x128xf32>
      %22 = vector.shape_cast %21 : vector<16x128xf32> to vector<1x16x128xf32>
      %cst_18 = arith.constant dense<0xFF800000> : vector<1x16xf32>
      %23 = vector.multi_reduction <maximumf>, %22, %cst_18 [2] : vector<1x16x128xf32> to vector<1x16xf32>
      %24 = tpu.concatenate %20, %23 in 0 : vector<1x16xf32>, vector<1x16xf32> -> vector<2x16xf32>
      %c0_19 = arith.constant 0 : index
      %c0_20 = arith.constant 0 : index
      %25 = vector.load %arg3[%c0_19, %c0_20] : memref<16x4xf32, #tpu.memory_space<vmem>>, vector<16x4xf32>
      %cst_21 = arith.constant dense<0.000000e+00> : vector<2x4xf32>
      %26 = tpu.matmul %24, %25, %cst_21 {dimension_numbers = #tpu.dot_dimension_numbers<[1], [0], [0], [1], [0, 0, 1, 1], [], []>} : vector<2x16xf32>, vector<16x4xf32>, vector<2x4xf32> -> vector<2x4xf32>
      %c0_22 = arith.constant 0 : index
      %c0_23 = arith.constant 0 : index
      %27 = vector.load %arg4[%c0_22, %c0_23] : memref<1x4xf32, #tpu.memory_space<vmem>>, vector<1x4xf32>
      %28 = vector.broadcast %27 : vector<1x4xf32> to vector<2x4xf32>
      %29 = arith.addf %26, %28 : vector<2x4xf32>
      %cst_24 = arith.constant 0.000000e+00 : f32
      %30 = vector.broadcast %cst_24 : f32 to vector<2x4xf32>
      %31 = arith.maximumf %29, %30 : vector<2x4xf32>
      %c0_25 = arith.constant 0 : index
      %c0_26 = arith.constant 0 : index
      %32 = vector.load %arg5[%c0_25, %c0_26] : memref<4x16xf32, #tpu.memory_space<vmem>>, vector<4x16xf32>
      %cst_27 = arith.constant dense<0.000000e+00> : vector<2x16xf32>
      %33 = tpu.matmul %31, %32, %cst_27 {dimension_numbers = #tpu.dot_dimension_numbers<[1], [0], [0], [1], [0, 0, 1, 1], [], []>} : vector<2x4xf32>, vector<4x16xf32>, vector<2x16xf32> -> vector<2x16xf32>
      %c0_28 = arith.constant 0 : index
      %c0_29 = arith.constant 0 : index
      %34 = vector.load %arg6[%c0_28, %c0_29] : memref<1x16xf32, #tpu.memory_space<vmem>>, vector<1x16xf32>
      %35 = vector.broadcast %34 : vector<1x16xf32> to vector<2x16xf32>
      %36 = arith.addf %33, %35 : vector<2x16xf32>
      %37 = vector.extract_strided_slice %36 {offsets = [0, 0], sizes = [1, 16], strides = [1, 1]} : vector<2x16xf32> to vector<1x16xf32>
      %38 = vector.extract_strided_slice %36 {offsets = [1, 0], sizes = [1, 16], strides = [1, 1]} : vector<2x16xf32> to vector<1x16xf32>
      %39 = arith.addf %37, %38 : vector<1x16xf32>
      %40 = arith.negf %39 : vector<1x16xf32>
      %41 = math.exp %40 : vector<1x16xf32>
      %cst_30 = arith.constant 1.000000e+00 : f32
      %42 = vector.broadcast %cst_30 : f32 to vector<1x16xf32>
      %43 = arith.addf %42, %41 : vector<1x16xf32>
      %44 = arith.divf %42, %43 : vector<1x16xf32>
      %c0_31 = arith.constant 0 : index
      %c0_32 = arith.constant 0 : index
      %c0_33 = arith.constant 0 : index
      %45 = vector.load %arg7[%c0_31, %c0_32, %c0_33] : memref<1x1x16xf32, #tpu.memory_space<vmem>>, vector<1x1x16xf32>
      %46 = vector.shape_cast %45 : vector<1x1x16xf32> to vector<1x16xf32>
      %47 = vector.shape_cast %44 : vector<1x16xf32> to vector<1x1x16xf32>
      tpu.vector_store %arg7[%c0_31, %c0_32, %c0_33], %47 {strides = array<i32>} : memref<1x1x16xf32, #tpu.memory_space<vmem>>, vector<1x1x16xf32>,
    } else {
    }
    return
  }
  func.func @transform_0(%arg0: i32, %arg1: i32) -> (i32, i32) {
    %c0_i32 = arith.constant 0 : i32
    return %arg0, %arg1 : i32, i32
  }
  func.func @transform_1(%arg0: i32, %arg1: i32) -> (i32, i32) {
    %c0_i32 = arith.constant 0 : i32
    %c0_i32_0 = arith.constant 0 : i32
    %c0_i32_1 = arith.constant 0 : i32
    return %c0_i32, %c0_i32_0 : i32, i32
  }
  func.func @transform_2(%arg0: i32, %arg1: i32) -> (i32, i32) {
    %c0_i32 = arith.constant 0 : i32
    %c0_i32_0 = arith.constant 0 : i32
    %c0_i32_1 = arith.constant 0 : i32
    return %c0_i32, %c0_i32_0 : i32, i32
  }
  func.func @transform_3(%arg0: i32, %arg1: i32) -> (i32, i32) {
    %c0_i32 = arith.constant 0 : i32
    %c0_i32_0 = arith.constant 0 : i32
    %c0_i32_1 = arith.constant 0 : i32
    return %c0_i32, %c0_i32_0 : i32, i32
  }
  func.func @transform_4(%arg0: i32, %arg1: i32) -> (i32, i32) {
    %c0_i32 = arith.constant 0 : i32
    %c0_i32_0 = arith.constant 0 : i32
    %c0_i32_1 = arith.constant 0 : i32
    return %c0_i32, %c0_i32_0 : i32, i32
  }
  func.func @transform_5(%arg0: i32, %arg1: i32) -> (i32, i32, i32) {
    %c0_i32 = arith.constant 0 : i32
    %c0_i32_0 = arith.constant 0 : i32
    %c0_i32_1 = arith.constant 0 : i32
    return %arg0, %c0_i32, %c0_i32_0 : i32, i32, i32
  }
}

</mosaic_0001>

<bundles_post_ra>
// kernel: tpu_custom_call.1
= control target key start
LH: loop header
LB: loop body
LE: loop exit
PB: predicated region body
PF: predicated region fallthrough
CT: control target
= control target key end

     0   :  { %10 = vsyncpa [#allocation5], 0  ;;  %s1017_s0 = inlined_call_operand.hbm [shape: f32[32,256], index: 0, kind: input, shape index: {}]   ;;  %s1018_s1 = inlined_call_operand.vmem [shape: f32[16,4], index: 1, kind: input, shape index: {}]   ;;  %s1019_s2 = inlined_call_operand.vmem [shape: f32[1,4], index: 2, kind: input, shape index: {}]   ;;  %s1020_s3 = inlined_call_operand.vmem [shape: f32[4,16], index: 3, kind: input, shape index: {}]   ;;  %s1021_s4 = inlined_call_operand.vmem [shape: f32[1,16], index: 4, kind: input, shape index: {}]   ;;  %s1022_s5 = inlined_call_operand.hbm [shape: f32[2,1,16], index: 5, kind: output, shape index: {}]  }
   0x1   :  { %12 = vsyncpa [#allocation5 + $0x1], 0 }
   0x2   :  { %13 = vsyncpa [#allocation6], 0 }
   0x3   :  { %15 = vsyncpa [#allocation6 + $0x1], 0  ;;  %s863_s18 = smov 0   ;;  %s865_s19 = smov 0  }
   0x4   :  { %s867_s20 = smov 0   ;;  %s869_s21 = smov 0  }
   0x5   :  { %s871_s22 = smov 0   ;;  %s873_s23 = smov 0  }
   0x6 LB: > { %s609_s24 = sadd.s32 4294967295, %s825_s23   ;;  %s610_s25 = sadd.s32 4294967294, %s825_s23   ;;  %s825_s23 = sphi %s873_s23, %s21_s23   ;;  %s821_s22 = sphi %s871_s22, %s1033_s22   ;;  %s817_s21 = sphi %s869_s21, %s1032_s21   ;;  %s813_s20 = sphi %s867_s20, %s1031_s20   ;;  %s809_s19 = sphi %s865_s19, %s1030_s19   ;;  %s805_s18 = sphi %s863_s18, %s1029_s18  }
   0x7   : > { %s33_s26 = sadd.s32 1, %s821_s22  ;;  %s42_s27 = sadd.s32 1, %s813_s20 }
   0x8   : > { %p35_p0 = scmp.ge.s32.totalorder %s33_s26, 2  ;;  %p49_p1 = scmp.ne.s32.totalorder %s813_s20, %s809_s19 }
   0x9   : > { %p50_p2 = scmp.eq.s32.totalorder %s825_s23, 0  ;;  %p55_p3 = scmp.ne.s32.totalorder %s809_s19, %s805_s18 }
   0xa   : > { %s1035_s26 = smov (%p35_p0, %s33_s26), 0  ;;  %p56_p5 = scmp.eq.s32.totalorder %s609_s24, 0 }
   0xb   : > { %p904_p4 = por %p50_p2, %p49_p1  ;;  %s37_s29 = ssub.s32 %s821_s22, %s1035_s26 }
   0xc   : > { %p163_p6 = scmp.eq.s32.totalorder %s609_s24, 1  ;;  %p40_p7 = scmp.eq.s32.totalorder %s37_s29, 0 }
   0xd   : > { %p910_p8 = por %p56_p5, %p55_p3  ;;  %p169_p10 = scmp.eq.s32.totalorder %s610_s25, 1 }
   0xe   : > { %p914_p9 = por %p163_p6, %p49_p1  ;;  %p659_p13 = scmp.lt.s32.totalorder %s825_s23, 2 }
   0xf   : > { %s919_s7 = scalar_select %p40_p7, %s813_s20, %s42_s27  }
  0x10   : > { %p921_p11 = por %p169_p10, %p55_p3  ;;  %s201_s9 = sand.u32 1, %s813_s20  }
  0x11   : > { %s613_s10 = sshll.u32 %s201_s9, 5  ;;  %s629_s11 = sshll.u32 %s821_s22, 9 }
  0x12   : > { %s214_s14 = scalar_lea.hbm %s1017_s0, %s629_s11  ;;  %s205_s15 = scalar_lea.vmem [#allocation4], %s613_s10 }
  0x13   : > { %s215_s16 = sshll.u32 %s205_s15, 4  ;;  %p934_p0 = pnand %p659_p13, %p904_p4  ;;  %s216_s16 = int_to_ptr.vmem [resolvable:$true] %s215_s16 }
  0x14   : > { %p617_p1 = scmp.ge.s32.totalorder %s825_s23, 1  ;;  %s202_s24 = scalar_lea.sflag [#allocation5], %s201_s9 }
  0x15   : > { %p719_p2 = pneg %p934_p0  ;;  %s730_s25 = scalar_lea.vmem %s216_s16, 512 }
  0x16   : > { %p731_p3 = scmp.ne.s32.totalorder %s216_s16, %s730_s25  ;;  %s827_s27 = smov [#allocation4]  }
  0x17   : > { %s735_s29 = sshll.u32 %s827_s27, 4  ;;  %s736_s29 = int_to_ptr.vmem [resolvable:$false] %s735_s29 }
  0x18   : > { %p733_p5 = pnand %p731_p3, %p719_p2  ;;  %s737_s10 = scalar_lea.vmem %s736_s29, 1024 }
  0x19   : > { %p738_p7 = scmp.lt.s32.totalorder %s216_s16, %s736_s29  ;;  %p739_p10 = scmp.lt.s32.totalorder %s737_s10, %s730_s25 }
  0x1a   : > { %p734_p6 = pneg %p733_p5 }
  0x1b   : > { %p740_p12 = por %p739_p10, %p738_p7 }
  0x1d   : > { %p741_p4 = pnand %p740_p12, %p734_p6 }
  0x1f   : > { %744 = shalt.err (!%p741_p4)
}
  0x20   : > { %s828_s28 = smov 256   ;;  %s829_s9 = smov 16  }
  0x21   : > { %654 = dma.hbm_to_vmem [thread:$0]  (!%p934_p0), %s214_s14, 512, %s216_s16, %s202_s24, %s828_s28, %s828_s28, %s829_s9  }
  0x22   : > { %p223_p13 = scmp.lt.s32.totalorder %s825_s23, 3 }
  0x24   : > { %p224_p2 = pnand %p617_p1, %p223_p13 }
  0x25   : > { %s947_s11 = sand.u32 (!%p224_p2), 1, %s809_s19  }
  0x26   : > { %227 = sbr.rel (%p224_p2) target bundleno = 636 (0x27c), region = 40  ;;  %s618_s12 = sshll.u32 (!%p224_p2), %s947_s11, 5 }
  0x27   : > { %s230_s13 = scalar_lea.sflag (!%p224_p2), [#allocation5], %s947_s11  ;;  %s233_s15 = scalar_lea.vmem (!%p224_p2), [#allocation4], %s618_s12 }
  0x2b   : > { %796 = dma.done.wait (%p910_p8), %s230_s13, 512  }
  0x2c   : > { %798 = vsyncadd (%p910_p8), %s230_s13, 4294966784  ;;  %v269_v0 = vld [vmem:[%s233_s15] sm:$0xff]  ;;  %v271_v1 = vld [vmem:[%s233_s15 + $0x8] sm:$0xff]  ;;  %v830_v8 = vmov 0.0   ;;  %vm831_vm0 = vmmov 0   ;;  %v309_v11 = vlaneseq  ;;  %vm320_vm1 = vcmask 130112  }
  0x2d   : > { %v270_v2 = vld [vmem:[%s233_s15 + $0x10] sm:$0xff]  ;;  %v275_v3 = vmax.f32 %v269_v0, %v271_v1  ;;  %v273_v4 = vadd.f32 %v271_v1, %v269_v0  ;;  %v272_v5 = vld [vmem:[%s233_s15 + $0x18] sm:$0xff]  ;;  %635 = vmatprep.subr.mxu0 %v830_v8  ;;  %v338_v9 = vld [vmem:[%s1018_s1 + $0x8] sm:$0xff]  ;;  %642 = vmatprep.subr.mxu1 %v830_v8  ;;  %vm335_vm2 = vcmask 1040384   ;;  %vm346_vm3 = vcmask 130048   ;;  %s625_s9 = sshll.u32 %s817_s21, 4 }
  0x2e   : > { %v276_v6 = vmax.f32 %v270_v2, %v272_v5  ;;  %v274_v7 = vadd.f32 %v272_v5, %v270_v2  ;;  %v337_v10 = vld [vmem:[%s1018_s1] sm:$0xff]  ;;  %636 = vmatpush3.msra.mxu0 %v338_v9  ;;  %639 = vmatprep.mubr.msk.f32.mxu0 %vm831_vm0, %v830_v8  ;;  %v310_v12 = vand.u32 127, %v309_v11  ;;  %v312_v14 = vshrl.u32 %v309_v11, 7  ;;  %s258_s12 = scalar_lea.vmem [#allocation7], %s947_s11  ;;  %s975_s16 = scalar_lea.hbm %s1022_s5, %s625_s9 }
  0x2f   : > { %303 = vmax.xlane.f32.xlu1 %v275_v3  ;;  %294 = vadd.xlane.f32.xlu0 %v273_v4  ;;  %v421_v30 = vld [vmem:[%s1020_s3] sm:$0xf]  ;;  %vm433_vm4 = vcmask 1043456   ;;  %vm429_vm5 = vcmask 31744   ;;  %s532_s13 = sshll.u32 %s258_s12, 4  ;;  %vm517_vm6 = vcmask 122880   ;;  %s533_s13 = int_to_ptr.vmem [resolvable:$true] %s532_s13 }
  0x30   : > { %637 = vmatprep.subr.mxu0 %v830_v8  ;;  %644 = vmatprep.mubr.msk.f32.mxu1 %vm831_vm0, %v830_v8  ;;  %v315_v13 = vadd.s32 4294967288, %v310_v12  ;;  %v313_v18 = vsub.s32 %v310_v12, %v312_v14  ;;  %v619_v31 = vld [vmem:[%s1019_s2] ss:$0 sm:$0xff]  ;;  %s520_s30 = scalar_lea.sflag [#allocation6], %s947_s11  ;;  %s745_s17 = scalar_lea.vmem %s533_s13, 16 }
  0x31   : > { %638 = vmatpush3.msra.mxu0 %v337_v10  ;;  %643 = vmatpush3.msk.msra.mxu1 %vm433_vm4, %v421_v30  ;;  %v621_v36 = vld [vmem:[%s1021_s4] ss:$0 sm:$0xff]  ;;  %p746_p8 = scmp.ne.s32.totalorder %s533_s13, %s745_s17  ;;  %s832_s24 = smov [#allocation7]  }
  0x32   : > { %v318_v17 = vsub.s32 %v315_v13, %v312_v14  ;;  %s749_s25 = sshll.u32 %s832_s24, 4  ;;  %s750_s25 = int_to_ptr.vmem [resolvable:$false] %s749_s25 }
  0x33   : > { %305 = vmax.xlane.f32.xlu1 %v276_v6  ;;  %296 = vadd.xlane.f32.xlu0 %v274_v7  ;;  %p747_p12 = pnand %p746_p8, %p914_p9  ;;  %s751_s21 = scalar_lea.vmem %s750_s25, 32 }
  0x34   : > { %p752_p1 = scmp.lt.s32.totalorder %s533_s13, %s750_s25  ;;  %p753_p3 = scmp.lt.s32.totalorder %s751_s21, %s745_s17 }
  0x35   : > { %p748_p0 = pneg %p747_p12 }
  0x36   : > { %p754_p5 = por %p753_p3, %p752_p1 }
  0x38   : > { %p755_p6 = pnand %p754_p5, %p748_p0 }
  0xb8   : > { %v304_v15 = vpop.xlane.xlu1 %303  ;;  %v295_v16 = vpop.xlane.xlu0 %294 }
  0xb9   : > { %v299_v19 = vmul.f32 0.00390625, %v295_v16  ;;  %v328_v24 = vrot.slane %v304_v15, %v313_v18 }
  0xbb   : > { %v314_v25 = vrot.slane %v299_v19, %v313_v18 }
  0xbc   : > { %v306_v20 = vpop.xlane.xlu1 %305  ;;  %v297_v21 = vpop.xlane.xlu0 %296 }
  0xbd   : > { %v332_v22 = vrot.slane %v306_v20, %v318_v17  ;;  %v300_v23 = vmul.f32 0.00390625, %v297_v21 }
  0xbf   : > { %v319_v26 = vrot.slane %v300_v23, %v318_v17  ;;  %v333_v27 = vsel %vm320_vm1, %v332_v22, %v328_v24 }
  0xc1   : > { %v321_v28 = vsel %vm320_vm1, %v319_v26, %v314_v25 }
  0xc2   : > { %v336_v29 = vsel %vm335_vm2, %v321_v28, %v333_v27 }
  0xc3   : > { %640 = vmatmul.mubr.msk.f32.vlgmr.msra.gmra.mxu0 %vm346_vm3, %v336_v29 }
 0x183   : > { %v416_v32 = vpop.f32.mrf.mxu0 }
 0x184   : > { %v417_v33 = vadd.f32 %v619_v31, %v416_v32 }
 0x185   : > { %v641_v34 = vpop.f32.mrf.mxu0 }
 0x186   : > { %v420_v35 = vmax.f32 %v417_v33, 0.0 }
 0x188   : > { %645 = vmatmul.mubr.msk.f32.vlgmr.msra.gmra.mxu1 %vm429_vm5, %v420_v35 }
 0x248   : > { %v503_v37 = vpop.f32.mrf.mxu1 }
 0x249   : > { %v504_v38 = vadd.f32 %v621_v36, %v503_v37 }
 0x24a   : > { %v646_v39 = vpop.f32.mrf.mxu1 }
 0x24b   : > { %v508_v40 = vrot.slane %v504_v38, 1 }
 0x24d   : > { %v510_v41 = vadd.f32 %v508_v40, %v504_v38 }
 0x24f   : > { %v624_v42 = vmul.f32 -1.442695, %v510_v41 }
 0x251   : > { %713 = vpow2.f32 %v624_v42 }
 0x25e   : > { %v714_v43 = vpop.eup %713 }
 0x25f   : > { %v514_v44 = vadd.f32 1.0, %v714_v43 }
 0x261   : > { %715 = vrcp.f32 %v514_v44 }
 0x26e   : > { %v716_v45 = vpop.eup %715 }
 0x26f   : > { %518 = vst.msk [vmem:[%s258_s12] sm:$0x1] %vm517_vm6, %v716_v45 }
 0x270   : > { %758 = shalt.err (!%p755_p6)
}
 0x271   : > { %s759_s27 = scalar_lea.hbm %s975_s16, 16  ;;  %s763_s10 = scalar_lea.hbm %s1022_s5, 32 }
 0x272   : > { %p760_p7 = scmp.ne.s32.totalorder %s975_s16, %s759_s27  ;;  %p764_p13 = scmp.lt.s32.totalorder %s975_s16, %s1022_s5 }
 0x273   : > { %p765_p2 = scmp.lt.s32.totalorder %s763_s10, %s759_s27 }
 0x274   : > { %p761_p10 = pnand %p760_p7, %p914_p9 }
 0x275   : > { %p766_p8 = por %p765_p2, %p764_p13 }
 0x276   : > { %p762_p4 = pneg %p761_p10 }
 0x278   : > { %p767_p12 = pnand %p766_p8, %p762_p4 }
 0x27a   : > { %770 = shalt.err (!%p767_p12)
}
 0x27b   : > { %649 = dma.vmem_to_hbm [thread:$0]  (%p914_p9), %s533_s13, 16, %s975_s16, %s520_s30  }
 0x27c PF: > { %s544_s12 = sand.u32 1, %s805_s18   ;;  %p1028_p0 = scmp.ge.s32.totalorder %s825_s23, 2 }
 0x27d   : > { %s545_s15 = scalar_lea.sflag [#allocation6], %s544_s12 }
 0x27e   : > { %p656_p1 = pnand %p1028_p0, %p921_p11 }
 0x280   : > { %p657_p3 = pneg %p656_p1 }
 0x282   : > { %800 = dma.done.wait (%p657_p3), %s545_s15, 16  }
 0x283   : > { %802 = vsyncadd (%p657_p3), %s545_s15, 4294967280  ;;  %s21_s23 = sadd.s32 1, %s825_s23   ;;  %s1029_s18 = smov %s809_s19 }
 0x284   : > { %p18_p5 = scmp.ge.s32.totalorder %s21_s23, 4   ;;  %s1030_s19 = smov %s813_s20 }
 0x285   : > { %s1031_s20 = smov %s919_s7  ;;  %s1032_s21 = smov %s821_s22 }
 0x286   : > { %s1033_s22 = smov %s1035_s26  ;;  %20 = sbr.rel (!%p18_p5) target bundleno = 6 (0x6), region = 93 }
 0x28b   :  { %549 = vsyncpa [#allocation5], 1 }
 0x28c   :  { %551 = vsyncpa [#allocation5 + $0x1], 1 }
 0x28d   :  { %552 = vsyncpa [#allocation6], 1 }
 0x28e   :  { %554 = vsyncpa [#allocation6 + $0x1], 1 }

</bundles_post_ra>
